<compile_context>
chip_gen: v7x
topology: tpu7x:2x2x1
jax: 0.10.0
libtpu: 0.0.40
codegen_flags: <defaults>
</compile_context>

<pallas_src>
import numpy as np
import jax
import jax.numpy as jnp
from jax.experimental import pallas as pl
from jax.experimental.pallas import tpu as pltpu


def adafs_soft_kernel(field_ref, w1_ref, b1_ref, w2_ref, b2_ref,
                      gsum_ref, gscat_ref, out_ref):
    x = field_ref[...].astype(jnp.float32)                               # (TR, LP)

    # controller MLP (block-diagonal packed): fc1 -> relu -> (dropout: id) -> fc2
    h = jnp.dot(x, w1_ref[...], preferred_element_type=jnp.float32) + b1_ref[...]
    h = jnp.maximum(h, 0.0)
    logits = jnp.dot(h, w2_ref[...], preferred_element_type=jnp.float32) + b2_ref[...]  # (TR, NP)

    # Per-group softmax (groups of `num` lanes).  Stabilize with the packed-row
    # max: it is constant within each group, so the result is mathematically
    # identical to per-group-max stabilization.
    m = jnp.max(logits, axis=1, keepdims=True)
    e = jnp.exp(logits - m)
    denom = jnp.dot(e, gsum_ref[...], preferred_element_type=jnp.float32)  # group sums, broadcast back
    inv = pl.reciprocal(denom, approx=True)          # EUP vrcp (free slot) ...
    inv = inv * (2.0 - denom * inv)                  # ... + one Newton step -> ~f32 accuracy (tiny array)
    w = e * inv                                                           # (TR, NP)

    # scatter each group weight over its features and scale
    scale = jnp.dot(w, gscat_ref[...], preferred_element_type=jnp.float32)  # (TR, LP)
    out_ref[...] = (x * scale).astype(out_ref.dtype)


def _round_up(x, m):
    return ((x + m - 1) // m) * m


def adafs_soft_forward(field, w1, b1, w2, b2, group_onehot, *, tile_rows=2048):
    """field: (B, D); w1: (D, H); b1: (1, H); w2: (H, num); b2: (1, num);
    group_onehot: (num, D) one-hot group-membership matrix."""
    B, D = field.shape
    H = w1.shape[1]
    num = w2.shape[1]

    # Lane-packing factor: P batch rows per 128-lane row when D allows it.
    if D < 128 and 128 % D == 0:
        P = 128 // D
    else:
        P = 1  # D already lane-sized (or awkward) -> plain layout.
    LP, HP, NP = P * D, P * H, P * num

    # Block-diagonal packed controller parameters (built once; tiny).
    eye_p = jnp.eye(P, dtype=jnp.float32)
    w1p = jnp.kron(eye_p, w1.astype(jnp.float32))                   # (LP, HP)
    w2p = jnp.kron(eye_p, w2.astype(jnp.float32))                   # (HP, NP)
    b1p = jnp.tile(b1.astype(jnp.float32), (1, P))                  # (1, HP)
    b2p = jnp.tile(b2.astype(jnp.float32), (1, P))                  # (1, NP)
    gscat = jnp.kron(eye_p, group_onehot.astype(jnp.float32))       # (NP, LP)
    gsum = jnp.kron(eye_p, jnp.ones((num, num), jnp.float32))       # (NP, NP)

    # Pack the batch: pad to whole tiles, then P rows per 128-lane row.
    rows = -(-B // P)                                 # packed rows needed
    tr = min(tile_rows, _round_up(rows, 8))           # sublane-aligned tile
    rows_pad = _round_up(rows, tr)
    b_pad = rows_pad * P
    field_p = field
    if b_pad != B:
        field_p = jnp.pad(field_p, ((0, b_pad - B), (0, 0)))
    field_p = field_p.reshape(rows_pad, LP)           # layout plumbing (no-op when P == 1)

    grid = (rows_pad // tr,)
    const = lambda i: (0, 0)

    out_p = pl.pallas_call(
        adafs_soft_kernel,
        out_shape=jax.ShapeDtypeStruct((rows_pad, LP), field.dtype),
        grid=grid,
        in_specs=[
            pl.BlockSpec((tr, LP), lambda i: (i, 0)),   # streamed field tile
            pl.BlockSpec((LP, HP), const),              # resident controller params
            pl.BlockSpec((1, HP), const),
            pl.BlockSpec((HP, NP), const),
            pl.BlockSpec((1, NP), const),
            pl.BlockSpec((NP, NP), const),              # group-sum mask
            pl.BlockSpec((NP, LP), const),              # group scatter
        ],
        out_specs=pl.BlockSpec((tr, LP), lambda i: (i, 0)),
        compiler_params=pltpu.CompilerParams(
            dimension_semantics=("parallel",),          # megacore sharding on v7x
            vmem_limit_bytes=32 * 1024 * 1024,          # explicit; safe on v5e/v6e/v7x
        ),
        # input_output_aliases={0: 0} could be added if the packed field view
        # is not needed afterwards (trims peak HBM footprint only).
    )(field_p, w1p, b1p, w2p, b2p, gsum, gscat)

    return out_p.reshape(b_pad, D)[:B]


def reference_forward(field, w1, b1, w2, b2, group_onehot):
    h = jnp.maximum(field @ w1 + b1, 0.0)
    logits = h @ w2 + b2
    w = jax.nn.softmax(logits, axis=1)
    return field * (w @ group_onehot)


if __name__ == "__main__":
    # Shapes consistent with the module:
    #   inputs_dim = {"f0": 8, "f1": 8, "f2": 8, "f3": 8}  ->  embed_dim D = 32
    #   num = number of fields = 4, controller hidden = D // 2 = 16
    inputs_dim = {"f0": 8, "f1": 8, "f2": 8, "f3": 8}
    dims = list(inputs_dim.values())
    num = len(dims)
    D = int(np.sum(dims))          # 32
    H = D // 2                     # 16

    key = jax.random.PRNGKey(0)
    k_field, k_w1, k_b1, k_w2, k_b2 = jax.random.split(key, 5)

    # Deterministic synthetic parameters (xavier-normal-like), pre-transposed to (in, out).
    w1 = jax.random.normal(k_w1, (D, H), dtype=jnp.float32) * np.sqrt(2.0 / (D + H))
    b1 = jax.random.normal(k_b1, (1, H), dtype=jnp.float32) * 0.01
    w2 = jax.random.normal(k_w2, (H, num), dtype=jnp.float32) * np.sqrt(2.0 / (H + num))
    b2 = jax.random.normal(k_b2, (1, num), dtype=jnp.float32) * 0.01

    # Static one-hot group membership matrix G: (num, D), G[i, j] = 1 iff
    # feature j belongs to group i (offsets from cumsum of inputs_dim).
    offsets = [0] + np.cumsum(dims).tolist()
    g_np = np.zeros((num, D), dtype=np.float32)
    for i in range(num):
        g_np[i, offsets[i]:offsets[i + 1]] = 1.0
    group_onehot = jnp.asarray(g_np)

    # Check two batch sizes: the nominal small one and a ragged one that
    # exercises the pad / tail-tile handling of the packed, gridded kernel.
    for B in (8, 37):
        field = jax.random.normal(k_field, (B, D), dtype=jnp.float32)
        out = adafs_soft_forward(field, w1, b1, w2, b2, group_onehot)
        out = jax.block_until_ready(out)
        ref = reference_forward(field, w1, b1, w2, b2, group_onehot)
        np.testing.assert_allclose(np.asarray(out), np.asarray(ref),
                                   rtol=5e-3, atol=1e-3)

    print("KERNEL_OK")
</pallas_src>

<mosaic_0001>
module attributes {stable_mosaic.version = 11 : i64} {
  func.func @adafs_soft_kernel(%arg0: i32, %arg1: memref<8x128xf32, #tpu.memory_space<vmem>>, %arg2: memref<128x64xf32, #tpu.memory_space<vmem>>, %arg3: memref<1x64xf32, #tpu.memory_space<vmem>>, %arg4: memref<64x16xf32, #tpu.memory_space<vmem>>, %arg5: memref<1x16xf32, #tpu.memory_space<vmem>>, %arg6: memref<16x16xf32, #tpu.memory_space<vmem>>, %arg7: memref<16x128xf32, #tpu.memory_space<vmem>>, %arg8: memref<8x128xf32, #tpu.memory_space<vmem>>) attributes {dimension_semantics = [#tpu.dimension_semantics<parallel>], iteration_bounds = array<i64: 1>, scalar_prefetch = 0 : i64, scratch_operands = 0 : i64, tpu.core_type = #tpu.core_type<tc>, window_params = [{transform_indices = @transform_0, window_bounds = array<i64: 8, 128>}, {pipeline_mode = #tpu.pipeline_mode<synchronous>, transform_indices = @transform_1, window_bounds = array<i64: 128, 64>}, {pipeline_mode = #tpu.pipeline_mode<synchronous>, transform_indices = @transform_2, window_bounds = array<i64: 1, 64>}, {pipeline_mode = #tpu.pipeline_mode<synchronous>, transform_indices = @transform_3, window_bounds = array<i64: 64, 16>}, {pipeline_mode = #tpu.pipeline_mode<synchronous>, transform_indices = @transform_4, window_bounds = array<i64: 1, 16>}, {pipeline_mode = #tpu.pipeline_mode<synchronous>, transform_indices = @transform_5, window_bounds = array<i64: 16, 16>}, {pipeline_mode = #tpu.pipeline_mode<synchronous>, transform_indices = @transform_6, window_bounds = array<i64: 16, 128>}, {transform_indices = @transform_7, window_bounds = array<i64: 8, 128>}]} {
    %c0 = arith.constant 0 : index
    %c0_0 = arith.constant 0 : index
    %0 = vector.load %arg1[%c0, %c0_0] : memref<8x128xf32, #tpu.memory_space<vmem>>, vector<8x128xf32>
    %c0_1 = arith.constant 0 : index
    %c0_2 = arith.constant 0 : index
    %1 = vector.load %arg2[%c0_1, %c0_2] : memref<128x64xf32, #tpu.memory_space<vmem>>, vector<128x64xf32>
    %cst = arith.constant dense<0.000000e+00> : vector<8x64xf32>
    %2 = tpu.matmul %0, %1, %cst {dimension_numbers = #tpu.dot_dimension_numbers<[1], [0], [0], [1], [0, 0, 1, 1], [], []>} : vector<8x128xf32>, vector<128x64xf32>, vector<8x64xf32> -> vector<8x64xf32>
    %c0_3 = arith.constant 0 : index
    %c0_4 = arith.constant 0 : index
    %3 = vector.load %arg3[%c0_3, %c0_4] : memref<1x64xf32, #tpu.memory_space<vmem>>, vector<1x64xf32>
    %4 = vector.broadcast %3 : vector<1x64xf32> to vector<8x64xf32>
    %5 = arith.addf %2, %4 : vector<8x64xf32>
    %cst_5 = arith.constant 0.000000e+00 : f32
    %6 = vector.broadcast %cst_5 : f32 to vector<8x64xf32>
    %7 = arith.maximumf %5, %6 : vector<8x64xf32>
    %c0_6 = arith.constant 0 : index
    %c0_7 = arith.constant 0 : index
    %8 = vector.load %arg4[%c0_6, %c0_7] : memref<64x16xf32, #tpu.memory_space<vmem>>, vector<64x16xf32>
    %cst_8 = arith.constant dense<0.000000e+00> : vector<8x16xf32>
    %9 = tpu.matmul %7, %8, %cst_8 {dimension_numbers = #tpu.dot_dimension_numbers<[1], [0], [0], [1], [0, 0, 1, 1], [], []>} : vector<8x64xf32>, vector<64x16xf32>, vector<8x16xf32> -> vector<8x16xf32>
    %c0_9 = arith.constant 0 : index
    %c0_10 = arith.constant 0 : index
    %10 = vector.load %arg5[%c0_9, %c0_10] : memref<1x16xf32, #tpu.memory_space<vmem>>, vector<1x16xf32>
    %11 = vector.broadcast %10 : vector<1x16xf32> to vector<8x16xf32>
    %12 = arith.addf %9, %11 : vector<8x16xf32>
    %cst_11 = arith.constant dense<0xFF800000> : vector<8xf32>
    %13 = vector.multi_reduction <maximumf>, %12, %cst_11 [1] : vector<8x16xf32> to vector<8xf32>
    %14 = vector.shape_cast %13 : vector<8xf32> to vector<8x1xf32>
    %15 = vector.broadcast %14 : vector<8x1xf32> to vector<8x16xf32>
    %16 = arith.subf %12, %15 : vector<8x16xf32>
    %17 = math.exp %16 : vector<8x16xf32>
    %c0_12 = arith.constant 0 : index
    %c0_13 = arith.constant 0 : index
    %18 = vector.load %arg6[%c0_12, %c0_13] : memref<16x16xf32, #tpu.memory_space<vmem>>, vector<16x16xf32>
    %cst_14 = arith.constant dense<0.000000e+00> : vector<8x16xf32>
    %19 = tpu.matmul %17, %18, %cst_14 {dimension_numbers = #tpu.dot_dimension_numbers<[1], [0], [0], [1], [0, 0, 1, 1], [], []>} : vector<8x16xf32>, vector<16x16xf32>, vector<8x16xf32> -> vector<8x16xf32>
    %20 = tpu.reciprocal %19 {approx = true} : vector<8x16xf32> -> vector<8x16xf32>
    %21 = arith.mulf %19, %20 : vector<8x16xf32>
    %cst_15 = arith.constant 2.000000e+00 : f32
    %22 = vector.broadcast %cst_15 : f32 to vector<8x16xf32>
    %23 = arith.subf %22, %21 : vector<8x16xf32>
    %24 = arith.mulf %20, %23 : vector<8x16xf32>
    %25 = arith.mulf %17, %24 : vector<8x16xf32>
    %c0_16 = arith.constant 0 : index
    %c0_17 = arith.constant 0 : index
    %26 = vector.load %arg7[%c0_16, %c0_17] : memref<16x128xf32, #tpu.memory_space<vmem>>, vector<16x128xf32>
    %cst_18 = arith.constant dense<0.000000e+00> : vector<8x128xf32>
    %27 = tpu.matmul %25, %26, %cst_18 {dimension_numbers = #tpu.dot_dimension_numbers<[1], [0], [0], [1], [0, 0, 1, 1], [], []>} : vector<8x16xf32>, vector<16x128xf32>, vector<8x128xf32> -> vector<8x128xf32>
    %28 = arith.mulf %0, %27 : vector<8x128xf32>
    %c0_19 = arith.constant 0 : index
    %c0_20 = arith.constant 0 : index
    %29 = vector.load %arg8[%c0_19, %c0_20] : memref<8x128xf32, #tpu.memory_space<vmem>>, vector<8x128xf32>
    tpu.vector_store %arg8[%c0_19, %c0_20], %28 {strides = array<i32>} : memref<8x128xf32, #tpu.memory_space<vmem>>, vector<8x128xf32>,
    return
  }
  func.func @transform_0(%arg0: i32) -> (i32, i32) {
    %c0_i32 = arith.constant 0 : i32
    %c0_i32_0 = arith.constant 0 : i32
    return %arg0, %c0_i32 : i32, i32
  }
  func.func @transform_1(%arg0: i32) -> (i32, i32) {
    %c0_i32 = arith.constant 0 : i32
    %c0_i32_0 = arith.constant 0 : i32
    %c0_i32_1 = arith.constant 0 : i32
    return %c0_i32, %c0_i32_0 : i32, i32
  }
  func.func @transform_2(%arg0: i32) -> (i32, i32) {
    %c0_i32 = arith.constant 0 : i32
    %c0_i32_0 = arith.constant 0 : i32
    %c0_i32_1 = arith.constant 0 : i32
    return %c0_i32, %c0_i32_0 : i32, i32
  }
  func.func @transform_3(%arg0: i32) -> (i32, i32) {
    %c0_i32 = arith.constant 0 : i32
    %c0_i32_0 = arith.constant 0 : i32
    %c0_i32_1 = arith.constant 0 : i32
    return %c0_i32, %c0_i32_0 : i32, i32
  }
  func.func @transform_4(%arg0: i32) -> (i32, i32) {
    %c0_i32 = arith.constant 0 : i32
    %c0_i32_0 = arith.constant 0 : i32
    %c0_i32_1 = arith.constant 0 : i32
    return %c0_i32, %c0_i32_0 : i32, i32
  }
  func.func @transform_5(%arg0: i32) -> (i32, i32) {
    %c0_i32 = arith.constant 0 : i32
    %c0_i32_0 = arith.constant 0 : i32
    %c0_i32_1 = arith.constant 0 : i32
    return %c0_i32, %c0_i32_0 : i32, i32
  }
  func.func @transform_6(%arg0: i32) -> (i32, i32) {
    %c0_i32 = arith.constant 0 : i32
    %c0_i32_0 = arith.constant 0 : i32
    %c0_i32_1 = arith.constant 0 : i32
    return %c0_i32, %c0_i32_0 : i32, i32
  }
  func.func @transform_7(%arg0: i32) -> (i32, i32) {
    %c0_i32 = arith.constant 0 : i32
    %c0_i32_0 = arith.constant 0 : i32
    return %arg0, %c0_i32 : i32, i32
  }
}

</mosaic_0001>

<bundles_post_ra>
// kernel: tpu_custom_call.1
= control target key start
LH: loop header
LB: loop body
LE: loop exit
PB: predicated region body
PF: predicated region fallthrough
CT: control target
= control target key end

     0   :  { %v568_v3 = vmov 0.0|0.0   ;;  %vm569_vm0 = vmmov 0   ;;  %v570_v6 = vmov 0.0   ;;  %s742_s0 = inlined_call_operand.vmem [shape: f32[8,128], index: 0, kind: input, shape index: {}]   ;;  %s743_s1 = inlined_call_operand.vmem [shape: f32[128,64], index: 1, kind: input, shape index: {}]   ;;  %s744_s2 = inlined_call_operand.vmem [shape: f32[1,64], index: 2, kind: input, shape index: {}]   ;;  %s745_s3 = inlined_call_operand.vmem [shape: f32[64,16], index: 3, kind: input, shape index: {}]   ;;  %s746_s4 = inlined_call_operand.vmem [shape: f32[1,16], index: 4, kind: input, shape index: {}]   ;;  %s747_s5 = inlined_call_operand.vmem [shape: f32[16,16], index: 5, kind: input, shape index: {}]   ;;  %s748_s6 = inlined_call_operand.vmem [shape: f32[16,128], index: 6, kind: input, shape index: {}]   ;;  %s749_s7 = inlined_call_operand.hbm [shape: f32[8,128], index: 7, kind: output, shape index: {}]  }
   0x1   :  { %v28_v0 = vld [vmem:[%s743_s1] sm:$0xff]  ;;  %v29_v1 = vld [vmem:[%s743_s1 + $0x8] sm:$0xff]  ;;  %v30_v2 = vld [vmem:[%s743_s1 + $0x10] sm:$0xff]  ;;  %494 = vmatprep.subr.bf16.mxu0 %v568_v3  ;;  %458 = vmatprep.mubr.msk.f32.mxu0 %vm569_vm0, %v570_v6 }
   0x2   :  { %v495_v4 = vpack.c.bf16 %v29_v1, %v28_v0  ;;  %v31_v5 = vld [vmem:[%s743_s1 + $0x18] sm:$0xff]  ;;  %518 = vmatprep.subr.bf16.mxu1 %v568_v3  ;;  %477 = vmatprep.mubr.msk.f32.mxu1 %vm569_vm0, %v570_v6  ;;  %v32_v8 = vld [vmem:[%s743_s1 + $0x20] sm:$0xff]  ;;  %v33_v9 = vld [vmem:[%s743_s1 + $0x28] sm:$0xff] }
   0x3   :  { %v498_v7 = vpack.c.bf16 %v31_v5, %v30_v2  ;;  %v122_v10 = vld [vmem:[%s745_s3] sm:$0xff]  ;;  %v123_v11 = vld [vmem:[%s745_s3 + $0x8] sm:$0xff]  ;;  %v124_v12 = vld [vmem:[%s745_s3 + $0x10] sm:$0xff]  ;;  %v501_v14 = vpack.c.bf16 %v33_v9, %v32_v8 }
   0x4   :  { %496 = vmatpush3.bf16.msra.mxu0 %v495_v4  ;;  %v125_v13 = vld [vmem:[%s745_s3 + $0x18] sm:$0xff]  ;;  %v519_v15 = vpack.c.bf16 %v123_v11, %v122_v10  ;;  %v34_v16 = vld [vmem:[%s743_s1 + $0x30] sm:$0xff] }
   0x5   :  { %497 = vmatprep.subr.bf16.mxu0 %v568_v3  ;;  %v35_v17 = vld [vmem:[%s743_s1 + $0x38] sm:$0xff] }
   0x8   :  { %499 = vmatpush3.bf16.msra.mxu0 %v498_v7 }
   0x9   :  { %500 = vmatprep.subr.bf16.mxu0 %v568_v3 }
   0xa   :  { %12 = vsyncpa [#allocation3], 0  ;;  %520 = vmatpush3.bf16.msra.mxu1 %v519_v15  ;;  %v522_v18 = vpack.c.bf16 %v125_v13, %v124_v12  ;;  %v126_v19 = vld [vmem:[%s745_s3 + $0x20] sm:$0xff]  ;;  %v127_v20 = vld [vmem:[%s745_s3 + $0x28] sm:$0xff]  ;;  %v504_v21 = vpack.c.bf16 %v35_v17, %v34_v16  ;;  %vm137_vm1 = vcmask 523264   ;;  %vm211_vm2 = vcmask 130048  }
   0xb   :  { %521 = vmatprep.subr.bf16.mxu1 %v568_v3  ;;  %v36_v22 = vld [vmem:[%s743_s1 + $0x40] sm:$0xff]  ;;  %v37_v23 = vld [vmem:[%s743_s1 + $0x48] sm:$0xff]  ;;  %v525_v24 = vpack.c.bf16 %v127_v20, %v126_v19  ;;  %v38_v26 = vld [vmem:[%s743_s1 + $0x50] sm:$0xff]  ;;  %s571_s11 = smov [#allocation2]  }
   0xc   :  { %502 = vmatpush3.bf16.msra.mxu0 %v501_v14  ;;  %v507_v25 = vpack.c.bf16 %v37_v23, %v36_v22  ;;  %v39_v27 = vld [vmem:[%s743_s1 + $0x58] sm:$0xff]  ;;  %v40_v29 = vld [vmem:[%s743_s1 + $0x60] sm:$0xff]  ;;  %v41_v30 = vld [vmem:[%s743_s1 + $0x68] sm:$0xff]  ;;  %s381_s12 = sshll.u32 %s571_s11, 4  ;;  %s382_s12 = int_to_ptr.vmem [resolvable:$true] %s381_s12 }
   0xd   :  { %503 = vmatprep.subr.bf16.mxu0 %v568_v3  ;;  %v510_v28 = vpack.c.bf16 %v39_v27, %v38_v26  ;;  %v513_v31 = vpack.c.bf16 %v41_v30, %v40_v29  ;;  %v42_v32 = vld [vmem:[%s743_s1 + $0x70] sm:$0xff]  ;;  %v43_v33 = vld [vmem:[%s743_s1 + $0x78] sm:$0xff]  ;;  %v27_v35 = vld [vmem:[%s742_s0] sm:$0xff]  ;;  %p549_p1 = scmp.lt.s32.totalorder %s382_s12, %s382_s12 }
   0xe   :  { %523 = vmatpush3.bf16.msra.mxu1 %v522_v18  ;;  %v516_v34 = vpack.c.bf16 %v43_v33, %v42_v32  ;;  %v128_v36 = vld [vmem:[%s745_s3 + $0x30] sm:$0xff]  ;;  %v129_v37 = vld [vmem:[%s745_s3 + $0x38] sm:$0xff]  ;;  %v389_v39 = vld [vmem:[%s744_s2] ss:$0 sm:$0xff] }
   0xf   :  { %524 = vmatprep.subr.bf16.mxu1 %v568_v3  ;;  %v528_v38 = vpack.c.bf16 %v129_v37, %v128_v36  ;;  %v390_v44 = vld [vmem:[%s746_s4] ss:$0 sm:$0xff]  ;;  %v219_v50 = vld [vmem:[%s747_s5 + $0x8] sm:$0xff] }
  0x10   :  { %505 = vmatpush3.bf16.msra.mxu0 %v504_v21  ;;  %v218_v49 = vld [vmem:[%s747_s5] sm:$0xff]  ;;  %v299_v57 = vld [vmem:[%s748_s6 + $0x8] sm:$0xff] }
  0x11   :  { %506 = vmatprep.subr.bf16.mxu0 %v568_v3  ;;  %v531_v51 = vpack.c.bf16 %v219_v50, %v218_v49  ;;  %v298_v56 = vld [vmem:[%s748_s6] sm:$0xff]  ;;  %s544_s6 = scalar_lea.vmem %s382_s12, 128 }
  0x12   :  { %526 = vmatpush3.bf16.msra.mxu1 %v525_v24  ;;  %v534_v58 = vpack.c.bf16 %v299_v57, %v298_v56  ;;  %p545_p0 = scmp.ne.s32.totalorder %s382_s12, %s544_s6  ;;  %p550_p2 = scmp.lt.s32.totalorder %s544_s6, %s544_s6 }
  0x13   :  { %527 = vmatprep.subr.bf16.mxu1 %v568_v3 }
  0x14   :  { %508 = vmatpush3.bf16.msra.mxu0 %v507_v25  ;;  %p551_p3 = por %p550_p2, %p549_p1 }
  0x15   :  { %509 = vmatprep.subr.bf16.mxu0 %v568_v3 }
  0x16   :  { %529 = vmatpush3.bf16.msra.mxu1 %v528_v38  ;;  %p552_p4 = pnand %p551_p3, %p545_p0 }
  0x17   :  { %530 = vmatprep.subr.bf16.mxu1 %v568_v3 }
  0x18   :  { %511 = vmatpush3.bf16.msra.mxu0 %v510_v28 }
  0x19   :  { %512 = vmatprep.subr.bf16.mxu0 %v568_v3 }
  0x1c   :  { %514 = vmatpush3.bf16.msra.mxu0 %v513_v31 }
  0x1d   :  { %515 = vmatprep.subr.bf16.mxu0 %v568_v3 }
  0x20   :  { %517 = vmatpush3.bf16.msra.mxu0 %v516_v34 }
  0x23   :  { %459 = vmatmul.mubr.f32.vlgmr.msra.gmra.mrb[0].mxu0 %v27_v35 }
  0xf6   :  { %v117_v40 = vpop.f32.mrb[0].mxu0 }
  0xf7   :  { %v118_v41 = vadd.f32 %v389_v39, %v117_v40  ;;  %v460_v42 = vpop.f32.mrb[1].mxu0 }
  0xf9   :  { %v121_v43 = vmax.f32 %v118_v41, 0.0 }
  0xfb   :  { %478 = vmatmul.mubr.msk.f32.vlgmr.msra.gmra.mrb[0].mxu1 %vm137_vm1, %v121_v43 }
  0xfc   :  { %484 = vmatprep.mubr.msk.f32.mxu1 %vm569_vm0, %v570_v6  ;;  %532 = vmatpush3.bf16.msra.mxu1 %v531_v51 }
  0xfd   :  { %533 = vmatprep.subr.bf16.mxu1 %v568_v3 }
 0x1ce   :  { %v207_v45 = vpop.f32.mrb[0].mxu1 }
 0x1cf   :  { %v208_v46 = vadd.f32 %v390_v44, %v207_v45  ;;  %v479_v47 = vpop.f32.mrb[1].mxu1 }
 0x1d1   :  { %v212_v48 = vsel %vm211_vm2, %v208_v46, -inf }
 0x1d2   :  { %213 = vmax.xlane.f32.xlu0 %v212_v48 }
 0x25f   :  { %v214_v52 = vpop.xlane.xlu0 %213 }
 0x260   :  { %v215_v53 = vsub.f32 %v208_v46, %v214_v52 }
 0x262   :  { %v216_v54 = vmul.f32 1.442695, %v215_v53 }
 0x264   :  { %540 = vpow2.f32 %v216_v54 }
 0x26e   :  { %v541_v55 = vpop.eup %540 }
 0x26f   :  { %485 = vmatmul.mubr.msk.f32.vlgmr.msra.gmra.mrb[2].mxu1 %vm211_vm2, %v541_v55 }
 0x270   :  { %491 = vmatprep.mubr.msk.f32.mxu1 %vm569_vm0, %v570_v6  ;;  %535 = vmatpush3.bf16.msra.mxu1 %v534_v58 }
 0x342   :  { %v289_v59 = vpop.f32.mrb[2].mxu1 }
 0x343   :  { %542 = vrcp.f32 %v289_v59  ;;  %v486_v60 = vpop.f32.mrb[3].mxu1 }
 0x34d   :  { %v543_v61 = vpop.eup %542 }
 0x34e   :  { %v294_v62 = vmul.f32 %v543_v61, %v289_v59 }
 0x350   :  { %v295_v63 = vsub.f32 2.0, %v294_v62 }
 0x352   :  { %v296_v0 = vmul.f32 %v543_v61, %v295_v63 }
 0x354   :  { %v297_v1 = vmul.f32 %v541_v55, %v296_v0 }
 0x356   :  { %492 = vmatmul.mubr.msk.f32.vlgmr.msra.gmra.mrb[4].mxu1 %vm211_vm2, %v297_v1 }
 0x429   :  { %v369_v2 = vpop.f32.mrb[4].mxu1 }
 0x42a   :  { %v373_v3 = vmul.f32 %v369_v2, %v27_v35  ;;  %v493_v4 = vpop.f32.mrb[5].mxu1 }
 0x42c   :  { %374 = vst [vmem:[#allocation2] sm:$0xff] %v373_v3 }
 0x42d   :  { %555 = shalt.err (!%p552_p4)
}
 0x42e   :  { %s556_s15 = scalar_lea.hbm %s749_s7, 128 }
 0x42f   :  { %p557_p5 = scmp.ne.s32.totalorder %s749_s7, %s556_s15  ;;  %p560_p6 = scmp.lt.u32.totalorder %s556_s15, %s749_s7 }
 0x431   :  { %p562_p7 = pnand %p560_p6, %p557_p5 }
 0x433   :  { %565 = shalt.err (!%p562_p7)
}
 0x434   :  { %384 = dma.vmem_to_hbm [thread:$0]  %s382_s12, 128, %s749_s7, [#allocation3]  }
 0x435   :  { %566 = dma.done.wait [#allocation3], 128  }
 0x436   :  { %567 = vsyncadd [#allocation3], 4294967168 }
 0x437   :  { %388 = vsyncpa [#allocation3], 1 }

</bundles_post_ra>
